<compile_context>
chip_gen: v5e
topology: v5e:2x2
jax: 0.10.0
libtpu: 0.0.40
codegen_flags: <defaults>
</compile_context>

<pallas_src>
import functools

import jax
import jax.numpy as jnp
from jax.experimental import pallas as pl
from jax.experimental.pallas import tpu as pltpu


def _round_up(a, b):
    return (a + b - 1) // b * b


def _pick_tile(padded_dim, candidates):
    """Largest candidate tile (multiple of 128) that divides padded_dim."""
    for c in candidates:
        if c <= padded_dim and padded_dim % c == 0:
            return c
    return padded_dim


def _sigmoid(y):
    # One EUP transcendental (tanh); stable for all y (no exp overflow,
    # no approximate reciprocal).
    return 0.5 * (jnp.tanh(0.5 * y) + 1.0)


def _policy_kernel_single_k(x_ref, w_ref, b_ref, o_ref):
    """Whole K fits one tile: dot -> +bias -> sigmoid -> store (no scratch)."""
    y = jnp.dot(x_ref[...], w_ref[...], preferred_element_type=jnp.float32)
    y = y + b_ref[...]
    o_ref[...] = _sigmoid(y).astype(o_ref.dtype)


def _policy_kernel_multi_k(x_ref, w_ref, b_ref, o_ref, acc_ref):
    """K-tiled accumulation with f32 VMEM accumulator and fused epilogue."""
    k = pl.program_id(2)

    @pl.when(k == 0)
    def _():
        acc_ref[...] = jnp.zeros_like(acc_ref)

    acc_ref[...] += jnp.dot(
        x_ref[...], w_ref[...], preferred_element_type=jnp.float32
    )

    @pl.when(k == pl.num_programs(2) - 1)
    def _():
        y = acc_ref[...] + b_ref[...]
        o_ref[...] = _sigmoid(y).astype(o_ref.dtype)


def prepare_params(weight, bias, *, use_bf16=False):
    """One-time prep (outside the hot path): transpose PyTorch [out, in]
    weight to [in, out] and zero-pad both dims to multiples of 128; pad bias
    to [1, Np] f32.  The returned arrays are reused across every forward call.
    """
    n_out, n_in = weight.shape
    in_dtype = jnp.bfloat16 if use_bf16 else jnp.float32
    kp = _round_up(n_in, 128)
    np_ = _round_up(n_out, 128)

    wt = weight.T.astype(in_dtype)                     # [in, out]
    if (kp, np_) != (n_in, n_out):
        wp = jnp.zeros((kp, np_), in_dtype).at[:n_in, :n_out].set(wt)
    else:
        wp = wt

    if np_ != n_out:
        bp = jnp.zeros((1, np_), jnp.float32).at[0, :n_out].set(
            bias.astype(jnp.float32))
    else:
        bp = bias.astype(jnp.float32).reshape(1, n_out)
    return wp, bp


@functools.partial(jax.jit, static_argnames=("n_out",))
def policy_forward(x, w_prepared, b_prepared, *, n_out):
    """x: [B, K] activations; w_prepared: [Kp, Np] (from prepare_params);
    b_prepared: [1, Np] f32.  Returns sigmoid(x @ W^T + b) of shape [B, n_out].
    """
    B, K = x.shape
    Kp, Np = w_prepared.shape
    in_dtype = w_prepared.dtype
    out_dtype = x.dtype

    # Sublane rounding: 16 rows for packed sub-32-bit dtypes, 8 for f32.
    sub = 16 if jnp.dtype(in_dtype).itemsize < 4 else 8

    # ---- Tile selection (lane-dense, divides padded dims) -----------------
    Bp0 = _round_up(B, sub)
    tm = Bp0 if Bp0 <= 512 else 512
    Bp = _round_up(Bp0, tm)

    tn = _pick_tile(Np, (512, 384, 256, 128))
    tk = _pick_tile(Kp, (1024, 512, 256, 128))

    # v7x megacore: make sure at least one "parallel" axis has >= 2 tiles.
    if Bp // tm == 1 and Np // tn == 1 and Np >= 256 and Np % 256 == 0:
        tn = Np // 2

    # ---- Pad x only if the static shape actually requires it --------------
    if (Bp, Kp) != (B, K):
        xp = jnp.zeros((Bp, Kp), in_dtype).at[:B, :K].set(x.astype(in_dtype))
    else:
        xp = x.astype(in_dtype)

    # ---- VMEM budget from the actual tiles ---------------------------------
    in_sz = jnp.dtype(in_dtype).itemsize
    out_sz = jnp.dtype(out_dtype).itemsize
    vmem_bytes = (
        2 * (tm * tk + tk * tn) * in_sz   # double-buffered x / w tiles
        + 2 * tm * tn * out_sz            # double-buffered output tile
        + tm * tn * 4                     # f32 accumulator scratch (worst case)
        + 2 * tn * 4                      # bias tile
    )
    vmem_limit = min(max(2 * vmem_bytes + (1 << 20), 4 << 20), 48 << 20)

    kgrid = Kp // tk
    if kgrid == 1:
        # Fast path: no accumulator scratch, no phase predication.
        out = pl.pallas_call(
            _policy_kernel_single_k,
            out_shape=jax.ShapeDtypeStruct((Bp, Np), out_dtype),
            grid=(Bp // tm, Np // tn),
            in_specs=[
                pl.BlockSpec((tm, Kp), lambda i, j: (i, 0)),   # x
                pl.BlockSpec((Kp, tn), lambda i, j: (0, j)),   # weight [in, out]
                pl.BlockSpec((1, tn), lambda i, j: (0, j)),    # bias
            ],
            out_specs=pl.BlockSpec((tm, tn), lambda i, j: (i, j)),
            compiler_params=pltpu.CompilerParams(
                dimension_semantics=("parallel", "parallel"),
                vmem_limit_bytes=vmem_limit,
            ),
        )(xp, w_prepared, b_prepared)
    else:
        out = pl.pallas_call(
            _policy_kernel_multi_k,
            out_shape=jax.ShapeDtypeStruct((Bp, Np), out_dtype),
            grid=(Bp // tm, Np // tn, kgrid),
            in_specs=[
                pl.BlockSpec((tm, tk), lambda i, j, k: (i, k)),   # x
                pl.BlockSpec((tk, tn), lambda i, j, k: (k, j)),   # weight
                pl.BlockSpec((1, tn), lambda i, j, k: (0, j)),    # bias
            ],
            out_specs=pl.BlockSpec((tm, tn), lambda i, j, k: (i, j)),
            scratch_shapes=[pltpu.VMEM((tm, tn), jnp.float32)],
            compiler_params=pltpu.CompilerParams(
                dimension_semantics=("parallel", "parallel", "arbitrary"),
                vmem_limit_bytes=vmem_limit,
            ),
        )(xp, w_prepared, b_prepared)

    # Strip padding only if there was any.
    if (Bp, Np) != (B, n_out):
        out = out[:B, :n_out]
    return out


def init_params(key, n):
    """Deterministic PyTorch-style Linear init: U(-1/sqrt(n), 1/sqrt(n))."""
    kw, kb = jax.random.split(key)
    bound = 1.0 / jnp.sqrt(jnp.float32(n))
    weight = jax.random.uniform(kw, (n, n), jnp.float32, -bound, bound)
    bias = jax.random.uniform(kb, (n,), jnp.float32, -bound, bound)
    return weight, bias


if __name__ == "__main__":
    key = jax.random.PRNGKey(0)
    k_x, k_p = jax.random.split(key)

    # Small shapes consistent with the module (batch=8, features n=32).
    # NOTE: at this size the call is launch-overhead bound; batch many rows
    # per call in real use to amortize the fixed per-call cost.
    B, N = 8, 32
    x = jax.random.normal(k_x, (B, N), jnp.float32)
    weight, bias = init_params(k_p, N)

    # Weight transpose/pad done ONCE, outside the per-step hot path.
    wp, bp = prepare_params(weight, bias, use_bf16=False)

    out = policy_forward(x, wp, bp, n_out=N)
    out = jax.block_until_ready(out)

    # Reference check in plain JAX (same math as torch.sigmoid(fc(x))).
    ref = jax.nn.sigmoid(x @ weight.T + bias)
    assert out.shape == (B, N)
    assert jnp.allclose(out, ref, atol=1e-4, rtol=1e-4)

    print("KERNEL_OK")
</pallas_src>

<mosaic_0001>
module attributes {stable_mosaic.version = 11 : i64} {
  func.func @_policy_kernel_single_k(%arg0: i32, %arg1: i32, %arg2: memref<8x128xf32, #tpu.memory_space<vmem>>, %arg3: memref<128x128xf32, #tpu.memory_space<vmem>>, %arg4: memref<1x128xf32, #tpu.memory_space<vmem>>, %arg5: memref<8x128xf32, #tpu.memory_space<vmem>>) attributes {dimension_semantics = [#tpu.dimension_semantics<parallel>, #tpu.dimension_semantics<parallel>], iteration_bounds = array<i64: 1, 1>, scalar_prefetch = 0 : i64, scratch_operands = 0 : i64, tpu.core_type = #tpu.core_type<tc>, window_params = [{transform_indices = @transform_0, window_bounds = array<i64: 8, 128>}, {transform_indices = @transform_1, window_bounds = array<i64: 128, 128>}, {transform_indices = @transform_2, window_bounds = array<i64: 1, 128>}, {transform_indices = @transform_3, window_bounds = array<i64: 8, 128>}]} {
    %c0 = arith.constant 0 : index
    %c0_0 = arith.constant 0 : index
    %0 = vector.load %arg2[%c0, %c0_0] : memref<8x128xf32, #tpu.memory_space<vmem>>, vector<8x128xf32>
    %c0_1 = arith.constant 0 : index
    %c0_2 = arith.constant 0 : index
    %1 = vector.load %arg3[%c0_1, %c0_2] : memref<128x128xf32, #tpu.memory_space<vmem>>, vector<128x128xf32>
    %cst = arith.constant dense<0.000000e+00> : vector<8x128xf32>
    %2 = tpu.matmul %0, %1, %cst {dimension_numbers = #tpu.dot_dimension_numbers<[1], [0], [0], [1], [0, 0, 1, 1], [], []>} : vector<8x128xf32>, vector<128x128xf32>, vector<8x128xf32> -> vector<8x128xf32>
    %c0_3 = arith.constant 0 : index
    %c0_4 = arith.constant 0 : index
    %3 = vector.load %arg4[%c0_3, %c0_4] : memref<1x128xf32, #tpu.memory_space<vmem>>, vector<1x128xf32>
    %4 = vector.broadcast %3 : vector<1x128xf32> to vector<8x128xf32>
    %5 = arith.addf %2, %4 : vector<8x128xf32>
    %cst_5 = arith.constant 5.000000e-01 : f32
    %6 = vector.broadcast %cst_5 : f32 to vector<8x128xf32>
    %7 = arith.mulf %6, %5 : vector<8x128xf32>
    %8 = math.tanh %7 : vector<8x128xf32>
    %cst_6 = arith.constant 1.000000e+00 : f32
    %9 = vector.broadcast %cst_6 : f32 to vector<8x128xf32>
    %10 = arith.addf %8, %9 : vector<8x128xf32>
    %cst_7 = arith.constant 5.000000e-01 : f32
    %11 = vector.broadcast %cst_7 : f32 to vector<8x128xf32>
    %12 = arith.mulf %11, %10 : vector<8x128xf32>
    %c0_8 = arith.constant 0 : index
    %c0_9 = arith.constant 0 : index
    %13 = vector.load %arg5[%c0_8, %c0_9] : memref<8x128xf32, #tpu.memory_space<vmem>>, vector<8x128xf32>
    tpu.vector_store %arg5[%c0_8, %c0_9], %12 {strides = array<i32>} : memref<8x128xf32, #tpu.memory_space<vmem>>, vector<8x128xf32>,
    return
  }
  func.func @transform_0(%arg0: i32, %arg1: i32) -> (i32, i32) {
    %c0_i32 = arith.constant 0 : i32
    %c0_i32_0 = arith.constant 0 : i32
    return %arg0, %c0_i32 : i32, i32
  }
  func.func @transform_1(%arg0: i32, %arg1: i32) -> (i32, i32) {
    %c0_i32 = arith.constant 0 : i32
    %c0_i32_0 = arith.constant 0 : i32
    return %c0_i32, %arg1 : i32, i32
  }
  func.func @transform_2(%arg0: i32, %arg1: i32) -> (i32, i32) {
    %c0_i32 = arith.constant 0 : i32
    %c0_i32_0 = arith.constant 0 : i32
    return %c0_i32, %arg1 : i32, i32
  }
  func.func @transform_3(%arg0: i32, %arg1: i32) -> (i32, i32) {
    %c0_i32 = arith.constant 0 : i32
    return %arg0, %arg1 : i32, i32
  }
}

</mosaic_0001>

<bundles_post_ra>
// kernel: policy_forward.1
= control target key start
LH: loop header
LB: loop body
LE: loop exit
PB: predicated region body
PF: predicated region fallthrough
CT: control target
= control target key end

     0   :  { %8 = vsyncpa [#allocation3], 0  ;;  %s189_s0 = inlined_call_operand.vmem [shape: f32[8,128], index: 0, kind: input, shape index: {}]   ;;  %s190_s1 = inlined_call_operand.hbm [shape: f32[128,128], index: 1, kind: input, shape index: {}]   ;;  %s191_s2 = inlined_call_operand.vmem [shape: f32[1,128], index: 2, kind: input, shape index: {}]   ;;  %s192_s3 = inlined_call_operand.hbm [shape: f32[8,128], index: 3, kind: output, shape index: {}]  }
   0x1   :  { %9 = vsyncpa [#allocation4], 0  ;;  %s16_s14 = sshll.u32 %s190_s1, 4  ;;  %s153_s15 = smov [#allocation2]   ;;  %s17_s14 = int_to_ptr.hbm [resolvable:$true] %s16_s14 }
   0x2   :  { %s18_s16 = sshll.u32 %s153_s15, 4  ;;  %s154_s17 = smov 128   ;;  %s19_s16 = int_to_ptr.vmem [resolvable:$true] %s18_s16 }
   0x3   :  { %s155_s18 = smov 8  }
   0x4   :  { %24 = dma.hbm_to_vmem [thread:$0]  %s17_s14, 2048, %s19_s16, [#allocation3], %s154_s17, %s154_s17, %s155_s18  }
   0x5   :  { %149 = dma.done.wait [#allocation3], 2048  }
   0x6   :  { %150 = vsyncadd [#allocation3], 4294965248  ;;  %v47_v0 = vld [vmem:[#allocation2 + $0x78] sm:$0xff]  ;;  %v46_v1 = vld [vmem:[#allocation2 + $0x70] sm:$0xff]  ;;  %s156_s22 = smov [#allocation5]   ;;  %s84_s26 = sshll.u32 %s192_s3, 4  ;;  %s85_s26 = int_to_ptr.hbm [resolvable:$true] %s84_s26 }
   0x7   :  { %52 = vmatpush.msra.mxu0 %v47_v0  ;;  %v45_v2 = vld [vmem:[#allocation2 + $0x68] sm:$0xff]  ;;  %v44_v3 = vld [vmem:[#allocation2 + $0x60] sm:$0xff]  ;;  %v43_v4 = vld [vmem:[#allocation2 + $0x58] sm:$0xff]  ;;  %s82_s23 = sshll.u32 %s156_s22, 4  ;;  %s83_s23 = int_to_ptr.vmem [resolvable:$true] %s82_s23 }
   0x8   :  { %v42_v5 = vld [vmem:[#allocation2 + $0x50] sm:$0xff]  ;;  %v41_v6 = vld [vmem:[#allocation2 + $0x48] sm:$0xff]  ;;  %v40_v7 = vld [vmem:[#allocation2 + $0x40] sm:$0xff] }
   0x9   :  { %53 = vmatpush.msra.mxu0 %v46_v1  ;;  %v39_v8 = vld [vmem:[#allocation2 + $0x38] sm:$0xff]  ;;  %v38_v9 = vld [vmem:[#allocation2 + $0x30] sm:$0xff]  ;;  %v37_v10 = vld [vmem:[#allocation2 + $0x28] sm:$0xff] }
   0xa   :  { %v36_v11 = vld [vmem:[#allocation2 + $0x20] sm:$0xff]  ;;  %v35_v12 = vld [vmem:[#allocation2 + $0x18] sm:$0xff]  ;;  %v34_v13 = vld [vmem:[#allocation2 + $0x10] sm:$0xff] }
   0xb   :  { %54 = vmatpush.msra.mxu0 %v45_v2  ;;  %v33_v14 = vld [vmem:[#allocation2 + $0x8] sm:$0xff]  ;;  %v32_v15 = vld [vmem:[#allocation2] sm:$0xff] }
   0xc   :  { %v31_v16 = vld [vmem:[%s189_s0] sm:$0xff] }
   0xd   :  { %55 = vmatpush.msra.mxu0 %v44_v3  ;;  %v98_v17 = vld [vmem:[%s191_s2] ss:$0 sm:$0xff] }
   0xf   :  { %56 = vmatpush.msra.mxu0 %v43_v4 }
  0x11   :  { %57 = vmatpush.msra.mxu0 %v42_v5 }
  0x13   :  { %58 = vmatpush.msra.mxu0 %v41_v6 }
  0x15   :  { %59 = vmatpush.msra.mxu0 %v40_v7 }
  0x17   :  { %60 = vmatpush.msra.mxu0 %v39_v8 }
  0x19   :  { %61 = vmatpush.msra.mxu0 %v38_v9 }
  0x1b   :  { %62 = vmatpush.msra.mxu0 %v37_v10 }
  0x1d   :  { %63 = vmatpush.msra.mxu0 %v36_v11 }
  0x1f   :  { %64 = vmatpush.msra.mxu0 %v35_v12 }
  0x21   :  { %65 = vmatpush.msra.mxu0 %v34_v13 }
  0x23   :  { %66 = vmatpush.msra.mxu0 %v33_v14 }
  0x25   :  { %67 = vmatpush.msra.mxu0 %v32_v15 }
  0x26   :  { %68 = vmatmul.f32.vlgmr.msra.gmra.mxu0 %v31_v16 }
  0xa3   :  { %v69_v18 = vpop.f32.mrf.mxu0 }
  0xa4   :  { %v70_v19 = vadd.f32 %v98_v17, %v69_v18 }
  0xa6   :  { %v72_v20 = vmul.f32 0.5, %v70_v19 }
  0xa8   :  { %99 = vtanh.f32 %v72_v20 }
  0xae   :  { %v100_v21 = vpop.eup %99 }
  0xaf   :  { %v74_v22 = vadd.f32 1.0, %v100_v21 }
  0xb1   :  { %v75_v23 = vmul.f32 0.5, %v74_v22 }
  0xb3   :  { %76 = vst [vmem:[#allocation5] sm:$0xff] %v75_v23 }
  0xb4   :  { %87 = dma.vmem_to_hbm [thread:$0]  %s83_s23, 128, %s85_s26, [#allocation4]  }
  0xb5   :  { %151 = dma.done.wait [#allocation4], 128  }
  0xb6   :  { %152 = vsyncadd [#allocation4], 4294967168 }
  0xb7   :  { %92 = vsyncpa [#allocation3], 1 }
  0xb8   :  { %93 = vsyncpa [#allocation4], 1 }

</bundles_post_ra>
